<compile_context>
chip_gen: v7x
topology: tpu7x:2x2x1
jax: 0.10.0
libtpu: 0.0.40
codegen_flags: <defaults>
</compile_context>

<pallas_src>
import jax
import jax.numpy as jnp
from jax.experimental import pallas as pl
from jax.experimental.pallas import tpu as pltpu

LANE = 128
SUBLANE = 8


def _ceil_to(x: int, m: int) -> int:
    return ((x + m - 1) // m) * m


# ---------------------------------------------------------------------------
# Pallas kernel: fused application of G gates, state resident in VMEM.
# ---------------------------------------------------------------------------
def _fused_circuit_kernel(state_ref, gates_ref, out_ref):
    # state_ref: (B, P)  planar [s_re | s_im | 0-pad]  (only read at step 0)
    # gates_ref: (1, P, P) block matrix for gate g = program_id(0)
    # out_ref:   (B, P)  constant index_map -> stays in VMEM across all gates.
    @pl.when(pl.program_id(0) == 0)
    def _():
        out_ref[...] = state_ref[...]

    out_ref[...] = jnp.dot(
        out_ref[...], gates_ref[0], preferred_element_type=jnp.float32
    )


def apply_circuit_planar(state_planar: jnp.ndarray, gate_blocks: jnp.ndarray) -> jnp.ndarray:
    """Applies G gates to a planar state in one pallas_call.

    state_planar : (B, P) float32, P a multiple of 128; [0:D)=re, [D:2D)=im, rest 0.
    gate_blocks  : (G, P, P) float32, each [[m_re, m_im], [-m_im, m_re]] zero-padded.
    Returns (B, P) float32 planar result == complex(state) @ M_0 @ M_1 @ ... @ M_{G-1}.
    """
    B, P = state_planar.shape
    G, P1, P2 = gate_blocks.shape
    assert P1 == P2 == P, "gate blocks must be (G, P, P) matching state width"
    assert P % LANE == 0 and B % SUBLANE == 0

    cost = pl.CostEstimate(
        flops=int(2 * G * B * P * P),
        transcendentals=0,
        bytes_accessed=int(4 * (B * P + G * P * P + B * P)),
    )

    return pl.pallas_call(
        _fused_circuit_kernel,
        out_shape=jax.ShapeDtypeStruct((B, P), jnp.float32),
        grid=(G,),
        in_specs=[
            pl.BlockSpec((B, P), lambda g: (0, 0)),        # state: resident
            pl.BlockSpec((1, P, P), lambda g: (g, 0, 0)),  # gate g: streamed
        ],
        out_specs=pl.BlockSpec((B, P), lambda g: (0, 0)),  # accumulator (constant idx)
        compiler_params=pltpu.CompilerParams(
            dimension_semantics=("arbitrary",),  # gate axis is a sequential dependency
        ),
        cost_estimate=cost,
    )(state_planar, gate_blocks)


# ---------------------------------------------------------------------------
# BuiltU construction (plain JAX glue) — done once, like torch __init__.
# ---------------------------------------------------------------------------
def build_u_matrix(qubit: int, single_qubit_u: jnp.ndarray, num_qubits: int) -> jnp.ndarray:
    """Mirrors BuiltU.__init__: kron over wires, gate at `qubit`, eye(2) elsewhere."""
    eye2 = jnp.eye(2, dtype=jnp.complex64)
    m = jnp.eye(1, dtype=jnp.complex64)
    u = single_qubit_u.astype(jnp.complex64)
    for i in range(num_qubits):
        m = jnp.kron(m, u if i == qubit else eye2)
    return m


def build_block_matrix(matrix_c: jnp.ndarray, padded_dim: int) -> jnp.ndarray:
    """Real (P, P) block form [[m_re, m_im], [-m_im, m_re]] zero-padded to lane width."""
    mr = jnp.real(matrix_c).astype(jnp.float32)
    mi = jnp.imag(matrix_c).astype(jnp.float32)
    blk = jnp.block([[mr, mi], [-mi, mr]])  # (2D, 2D)
    pad = padded_dim - blk.shape[0]
    if pad > 0:
        blk = jnp.pad(blk, ((0, pad), (0, pad)))
    return blk


# ---------------------------------------------------------------------------
# Boundary conversions (only at circuit entry/exit, never per gate).
# ---------------------------------------------------------------------------
def complex_to_planar(state_c: jnp.ndarray, padded_dim: int, padded_batch: int) -> jnp.ndarray:
    sp = jnp.concatenate(
        [jnp.real(state_c).astype(jnp.float32), jnp.imag(state_c).astype(jnp.float32)],
        axis=1,
    )
    b, k = sp.shape
    return jnp.pad(sp, ((0, padded_batch - b), (0, padded_dim - k)))


def planar_to_complex(state_p: jnp.ndarray, dim: int, batch: int) -> jnp.ndarray:
    return (state_p[:batch, :dim] + 1j * state_p[:batch, dim:2 * dim]).astype(jnp.complex64)


def built_u_forward(state_c: jnp.ndarray, matrix_c: jnp.ndarray) -> jnp.ndarray:
    """Complex-in / complex-out wrapper matching torch `forward`: state @ matrix.

    (Convenience path: builds the padded block matrix here; a real circuit should
    precompute the stacked gate blocks once and call apply_circuit_planar directly.)
    """
    D = matrix_c.shape[0]
    P = _ceil_to(2 * D, LANE)
    B = state_c.shape[0]
    Bp = _ceil_to(B, SUBLANE)
    gate_blocks = build_block_matrix(matrix_c, P)[None]  # (1, P, P)
    out_p = apply_circuit_planar(complex_to_planar(state_c, P, Bp), gate_blocks)
    return planar_to_complex(out_p, D, B)


if __name__ == "__main__":
    num_qubits = 5          # dimension D = 2**5 = 32
    batch = 8
    D = 2 ** num_qubits
    P = _ceil_to(2 * D, LANE)       # 128: lane-dense planar width
    Bp = _ceil_to(batch, SUBLANE)   # 8

    # Deterministic single-qubit unitaries: RX(theta_q) on each qubit q.
    def rx(theta):
        c = jnp.cos(theta / 2.0)
        s = jnp.sin(theta / 2.0)
        return jnp.array([[c, -1j * s], [-1j * s, c]], dtype=jnp.complex64)

    thetas = [0.3, 0.7, 1.1, 1.9, 2.3]
    big_mats = [build_u_matrix(q, rx(thetas[q]), num_qubits) for q in range(num_qubits)]

    # Circuit build time: precompute stacked padded block matrices ONCE.
    gate_blocks = jnp.stack([build_block_matrix(m, P) for m in big_mats])  # (G, P, P)

    key = jax.random.PRNGKey(0)
    kr, ki = jax.random.split(key)
    state_re = jax.random.normal(kr, (batch, D), dtype=jnp.float32)
    state_im = jax.random.normal(ki, (batch, D), dtype=jnp.float32)
    state = (state_re + 1j * state_im).astype(jnp.complex64)

    # --- Fused circuit: all gates in one pallas_call, state resident in VMEM ---
    state_planar = complex_to_planar(state, P, Bp)
    out_planar = jax.block_until_ready(apply_circuit_planar(state_planar, gate_blocks))
    out = planar_to_complex(out_planar, D, batch)

    # Reference: sequential complex matmuls (torch semantics: state @ matrix per gate).
    ref = state
    for m in big_mats:
        ref = ref @ m
    assert jnp.allclose(out, ref, atol=1e-4, rtol=1e-4), "fused circuit mismatch vs reference"

    # Padded lanes must remain exactly zero.
    assert jnp.all(out_planar[:, 2 * D:] == 0.0), "padding lanes contaminated"

    # --- Single-gate forward wrapper (exact BuiltU.forward semantics) ---
    out1 = jax.block_until_ready(built_u_forward(state, big_mats[2]))
    ref1 = state @ big_mats[2]
    assert jnp.allclose(out1, ref1, atol=1e-4, rtol=1e-4), "single-gate forward mismatch"

    print("KERNEL_OK")
</pallas_src>

<mosaic_0001>
module attributes {stable_mosaic.version = 11 : i64} {
  func.func @_fused_circuit_kernel(%arg0: i32, %arg1: memref<8x128xf32, #tpu.memory_space<vmem>>, %arg2: memref<1x128x128xf32, #tpu.memory_space<vmem>>, %arg3: memref<8x128xf32, #tpu.memory_space<vmem>>) attributes {dimension_semantics = [#tpu.dimension_semantics<arbitrary>], iteration_bounds = array<i64: 5>, scalar_prefetch = 0 : i64, scratch_operands = 0 : i64, tpu.core_type = #tpu.core_type<tc>, window_params = [{pipeline_mode = #tpu.pipeline_mode<synchronous>, transform_indices = @transform_0, window_bounds = array<i64: 8, 128>}, {transform_indices = @transform_1, window_bounds = array<i64: 1, 128, 128>}, {pipeline_mode = #tpu.pipeline_mode<synchronous>, transform_indices = @transform_2, window_bounds = array<i64: 8, 128>}]} {
    %c0_i32 = arith.constant 0 : i32
    %0 = arith.cmpi eq, %arg0, %c0_i32 : i32
    %1 = arith.extui %0 : i1 to i32
    %c0_i32_0 = arith.constant 0 : i32
    %2 = arith.cmpi ne, %1, %c0_i32_0 : i32
    scf.if %2 {
      %c0_7 = arith.constant 0 : index
      %c0_8 = arith.constant 0 : index
      %8 = vector.load %arg1[%c0_7, %c0_8] : memref<8x128xf32, #tpu.memory_space<vmem>>, vector<8x128xf32>
      %c0_9 = arith.constant 0 : index
      %c0_10 = arith.constant 0 : index
      %9 = vector.load %arg3[%c0_9, %c0_10] : memref<8x128xf32, #tpu.memory_space<vmem>>, vector<8x128xf32>
      tpu.vector_store %arg3[%c0_9, %c0_10], %8 {strides = array<i32>} : memref<8x128xf32, #tpu.memory_space<vmem>>, vector<8x128xf32>,
    } else {
    }
    %c0 = arith.constant 0 : index
    %c0_1 = arith.constant 0 : index
    %3 = vector.load %arg3[%c0, %c0_1] : memref<8x128xf32, #tpu.memory_space<vmem>>, vector<8x128xf32>
    %c0_2 = arith.constant 0 : index
    %c0_3 = arith.constant 0 : index
    %c0_4 = arith.constant 0 : index
    %4 = vector.load %arg2[%c0_2, %c0_3, %c0_4] : memref<1x128x128xf32, #tpu.memory_space<vmem>>, vector<1x128x128xf32>
    %5 = vector.shape_cast %4 : vector<1x128x128xf32> to vector<128x128xf32>
    %cst = arith.constant dense<0.000000e+00> : vector<8x128xf32>
    %6 = tpu.matmul %3, %5, %cst {dimension_numbers = #tpu.dot_dimension_numbers<[1], [0], [0], [1], [0, 0, 1, 1], [], []>} : vector<8x128xf32>, vector<128x128xf32>, vector<8x128xf32> -> vector<8x128xf32>
    %c0_5 = arith.constant 0 : index
    %c0_6 = arith.constant 0 : index
    %7 = vector.load %arg3[%c0_5, %c0_6] : memref<8x128xf32, #tpu.memory_space<vmem>>, vector<8x128xf32>
    tpu.vector_store %arg3[%c0_5, %c0_6], %6 {strides = array<i32>} : memref<8x128xf32, #tpu.memory_space<vmem>>, vector<8x128xf32>,
    return
  }
  func.func @transform_0(%arg0: i32) -> (i32, i32) {
    %c0_i32 = arith.constant 0 : i32
    %c0_i32_0 = arith.constant 0 : i32
    %c0_i32_1 = arith.constant 0 : i32
    return %c0_i32, %c0_i32_0 : i32, i32
  }
  func.func @transform_1(%arg0: i32) -> (i32, i32, i32) {
    %c0_i32 = arith.constant 0 : i32
    %c0_i32_0 = arith.constant 0 : i32
    %c0_i32_1 = arith.constant 0 : i32
    return %arg0, %c0_i32, %c0_i32_0 : i32, i32, i32
  }
  func.func @transform_2(%arg0: i32) -> (i32, i32) {
    %c0_i32 = arith.constant 0 : i32
    %c0_i32_0 = arith.constant 0 : i32
    %c0_i32_1 = arith.constant 0 : i32
    return %c0_i32, %c0_i32_0 : i32, i32
  }
}

</mosaic_0001>

<bundles_post_ra>
// kernel: tpu_custom_call.1
= control target key start
LH: loop header
LB: loop body
LE: loop exit
PB: predicated region body
PF: predicated region fallthrough
CT: control target
= control target key end

     0   :  { %7 = vsyncpa [#allocation3], 0  ;;  %s818_s0 = inlined_call_operand.hbm [shape: f32[8,128], index: 0, kind: input, shape index: {}]   ;;  %s819_s1 = inlined_call_operand.hbm [shape: f32[5,128,128], index: 1, kind: input, shape index: {}]   ;;  %s820_s2 = inlined_call_operand.hbm [shape: f32[8,128], index: 2, kind: output, shape index: {}]  }
   0x1   :  { %8 = vsyncpa [#allocation6], 0 }
   0x2   :  { %10 = vsyncpa [#allocation6 + $0x1], 0 }
   0x3   :  { %11 = vsyncpa [#allocation4], 0  ;;  %s631_s9 = smov 0   ;;  %s633_s10 = smov 0  }
   0x4   :  { %s635_s11 = smov 0   ;;  %s637_s12 = smov 0  }
   0x5 LB: > { %s650_s13 = sadd.s32 4294967295, %s606_s12   ;;  %s653_s14 = sadd.s32 1, %s606_s12   ;;  %s606_s12 = sphi %s637_s12, %s839_s12   ;;  %s602_s11 = sphi %s635_s11, %s838_s11   ;;  %s598_s10 = sphi %s633_s10, %s837_s10   ;;  %s594_s9 = sphi %s631_s9, %s836_s9  }
   0x6   : > { %s42_s15 = ssub.s32 %s606_s12, %s653_s14  ;;  %s45_s16 = sadd.s32 1, %s602_s11 }
   0x7   : > { %p43_p0 = scmp.eq.s32.totalorder %s42_s15, 0  ;;  %p52_p1 = scmp.ne.s32.totalorder %s602_s11, %s598_s10 }
   0x8   : > { %p53_p2 = scmp.eq.s32.totalorder %s606_s12, 0  ;;  %p58_p3 = scmp.ne.s32.totalorder %s598_s10, %s594_s9 }
   0x9   : > { %s663_s17 = scalar_select %p43_p0, %s602_s11, %s45_s16  }
   0xa   : > { %p665_p4 = por %p53_p2, %p52_p1  ;;  %p821_p5 = scmp.eq.s32.totalorder %s650_s13, 0 }
   0xb   : > { %p327_p6 = scmp.ge.s32.totalorder %s606_s12, 1  ;;  %p90_p7 = scmp.lt.s32.totalorder %s606_s12, 6 }
   0xc   : > { %p674_p8 = por %p821_p5, %p58_p3  ;;  %s608_s21 = smov [#allocation2]  }
   0xd   : > { %p679_p10 = pnand %p327_p6, %p90_p7  ;;  %s103_s22 = sshll.u32 %s608_s21, 4  ;;  %s104_s22 = int_to_ptr.vmem [resolvable:$true] %s103_s22 }
   0xe   : > { %s826_s19 = scalar_select %p674_p8, 1, 0 }
   0xf   : > { %s827_s20 = scalar_select %p679_p10, 1, 0 }
  0x10   : > { %p428_p11 = pneg %p679_p10  ;;  %p437_p12 = scmp.lt.s32.totalorder %s606_s12, 5 }
  0x11   : > { %s114_s23 = sand.u32 1, %s602_s11   ;;  %s480_s29 = scalar_lea.hbm %s818_s0, 128 }
  0x12   : > { %p689_p13 = pnand %p428_p11, %p821_p5  ;;  %p695_p0 = pnand %p437_p12, %p665_p4 }
  0x13   : > { %s330_s26 = sshll.u32 %s114_s23, 7  ;;  %p481_p1 = scmp.ne.s32.totalorder %s818_s0, %s480_s29 }
  0x14   : > { %s829_s25 = scalar_select %p695_p0, 1, 0 }
  0x15   : > { %p482_p2 = pneg %p689_p13  ;;  %p487_p4 = scmp.lt.u32.totalorder %s480_s29, %s818_s0 }
  0x17   : > { %p483_p3 = pnand %p482_p2, %p481_p1 }
  0x19   : > { %p484_p6 = pneg %p483_p3 }
  0x1b   : > { %p489_p7 = pnand %p487_p4, %p484_p6 }
  0x1d   : > { %492 = shalt.err (!%p489_p7)
}
  0x1e   : > { %s493_s6 = scalar_lea.vmem %s104_s22, 128  ;;  %p501_p5 = scmp.lt.s32.totalorder %s104_s22, %s104_s22 }
  0x1f   : > { %p494_p11 = scmp.ne.s32.totalorder %s104_s22, %s493_s6  ;;  %p502_p8 = scmp.lt.s32.totalorder %s493_s6, %s493_s6 }
  0x21   : > { %p496_p12 = pnand %p494_p11, %p482_p2  ;;  %p503_p10 = por %p502_p8, %p501_p5 }
  0x23   : > { %p497_p9 = pneg %p496_p12 }
  0x25   : > { %p504_p0 = pnand %p503_p10, %p497_p9 }
  0x27   : > { %507 = shalt.err (!%p504_p0)
}
  0x28   : > { %431 = dma.hbm_to_vmem [thread:$0]  (!%p689_p13), %s818_s0, 128, %s104_s22, [#allocation3]  }
  0x29   : > { %s341_s9 = sshll.u32 %s606_s12, 11  ;;  %s118_s21 = scalar_lea.vmem [#allocation5], %s330_s26 }
  0x2a   : > { %s719_s18 = scalar_lea.hbm %s819_s1, %s341_s9  ;;  %s125_s27 = sshll.u32 %s118_s21, 4  ;;  %s721_s27 = int_to_ptr.vmem [resolvable:$true] %s125_s27 }
  0x2b   : > { %s723_s24 = scalar_lea.sflag [#allocation6], %s114_s23  ;;  %s508_s28 = scalar_lea.hbm %s719_s18, 2048 }
  0x2c   : > { %p509_p5 = scmp.ne.s32.totalorder %s719_s18, %s508_s28  ;;  %p830_p8 = scmp.ne.s32.totalorder %s829_s25, 0 }
  0x2d   : > { %s513_s29 = scalar_lea.hbm %s819_s1, 10240  ;;  %p514_p0 = scmp.lt.u32.totalorder %s719_s18, %s819_s1 }
  0x2e   : > { %p510_p9 = pneg %p830_p8  ;;  %p515_p1 = scmp.lt.u32.totalorder %s513_s29, %s508_s28 }
  0x2f   : > { %p517_p3 = scmp.lt.u32.totalorder %s508_s28, %s719_s18 }
  0x30   : > { %p511_p10 = pnand %p510_p9, %p509_p5  ;;  %p516_p2 = por %p515_p1, %p514_p0 }
  0x32   : > { %p512_p13 = pneg %p511_p10  ;;  %p518_p6 = por %p517_p3, %p516_p2 }
  0x34   : > { %p519_p4 = pnand %p518_p6, %p512_p13 }
  0x36   : > { %522 = shalt.err (!%p519_p4)
}
  0x37   : > { %s523_s23 = scalar_lea.vmem %s721_s27, 2048  ;;  %s609_s26 = smov [#allocation5]  }
  0x38   : > { %p524_p7 = scmp.ne.s32.totalorder %s721_s27, %s523_s23  ;;  %s528_s4 = sshll.u32 %s609_s26, 4  ;;  %s529_s4 = int_to_ptr.vmem [resolvable:$false] %s528_s4 }
  0x39   : > { %s530_s5 = scalar_lea.vmem %s529_s4, 4096  ;;  %p531_p5 = scmp.lt.s32.totalorder %s721_s27, %s529_s4 }
  0x3a   : > { %p526_p11 = pnand %p524_p7, %p510_p9  ;;  %p532_p10 = scmp.lt.s32.totalorder %s530_s5, %s523_s23 }
  0x3c   : > { %p527_p12 = pneg %p526_p11  ;;  %p533_p0 = por %p532_p10, %p531_p5 }
  0x3e   : > { %p534_p1 = pnand %p533_p0, %p527_p12 }
  0x40   : > { %537 = shalt.err (!%p534_p1)
}
  0x41   : > { %s610_s6 = smov 128   ;;  %s611_s7 = smov 8  }
  0x42   : > { %435 = dma.hbm_to_vmem [thread:$0]  (!%p830_p8), %s719_s18, 2048, %s721_s27, %s723_s24, %s610_s6, %s610_s6, %s611_s7  }
  0x43   : > { %p831_p9 = scmp.ne.s32.totalorder %s827_s20, 0 }
  0x44   : > { %p832_p13 = scmp.eq.s32.totalorder (!%p831_p9), %s650_s13, 0 }
  0x45   : > { %137 = sbr.rel (%p831_p9) target bundleno = 351 (0x15f), region = 28 }
  0x4c   : > { %581 = dma.done.wait (%p832_p13), [#allocation3], 128   ;;  %p833_p2 = pmov %p832_p13 }
  0x4d   : > { %s143_s8 = sand.u32 1, %s598_s10   ;;  %p834_p3 = scmp.ne.s32.totalorder %s826_s19, 0 }
  0x4e   : > { %583 = vsyncadd (%p833_p2), [#allocation3], 4294967168  ;;  %s335_s9 = sshll.u32 %s143_s8, 7  ;;  %s144_s15 = scalar_lea.sflag [#allocation6], %s143_s8 }
  0x4f   : > { %s758_s16 = scalar_lea.vmem [#allocation5], %s335_s9 }
  0x50   : > { %585 = dma.done.wait (%p834_p3), %s144_s15, 2048  }
  0x51   : > { %587 = vsyncadd (%p834_p3), %s144_s15, 4294965248  ;;  %p835_p8 = scmp.ne.s32.totalorder %s650_s13, 0 }
  0x52   : > { %v167_v0 = vld [vmem:[#allocation2] sm:$0xff] (!%p835_p8) }
  0x53   : > { %166 = sbr.rel (%p835_p8) target bundleno = 90 (0x5a), region = 40  ;;  %168 = vst [vmem:[#allocation7] sm:$0xff] (!%p835_p8), %v167_v0 }
  0x5a PF: > { %v170_v1 = vld [vmem:[%s758_s16] sm:$0xff]  ;;  %v171_v2 = vld [vmem:[%s758_s16 + $0x8] sm:$0xff]  ;;  %v172_v3 = vld [vmem:[%s758_s16 + $0x10] sm:$0xff]  ;;  %v612_v4 = vmov 0.0|0.0   ;;  %vm613_vm0 = vmmov 0   ;;  %v614_v7 = vmov 0.0  }
  0x5b   : > { %394 = vmatprep.subr.bf16.mxu0 %v612_v4  ;;  %v395_v5 = vpack.c.bf16 %v171_v2, %v170_v1  ;;  %v173_v6 = vld [vmem:[%s758_s16 + $0x18] sm:$0xff]  ;;  %391 = vmatprep.mubr.msk.f32.mxu0 %vm613_vm0, %v614_v7  ;;  %v174_v9 = vld [vmem:[%s758_s16 + $0x20] sm:$0xff]  ;;  %v175_v10 = vld [vmem:[%s758_s16 + $0x28] sm:$0xff]  ;;  %s615_s19 = smov [#allocation7]   ;;  %p439_p6 = scmp.eq.s32.totalorder %s650_s13, 4 }
  0x5c   : > { %v398_v8 = vpack.c.bf16 %v173_v6, %v172_v3  ;;  %v401_v11 = vpack.c.bf16 %v175_v10, %v174_v9  ;;  %v176_v12 = vld [vmem:[%s758_s16 + $0x30] sm:$0xff]  ;;  %v177_v13 = vld [vmem:[%s758_s16 + $0x38] sm:$0xff]  ;;  %v178_v15 = vld [vmem:[%s758_s16 + $0x40] sm:$0xff]  ;;  %s264_s20 = sshll.u32 %s615_s19, 4  ;;  %s265_s20 = int_to_ptr.vmem [resolvable:$true] %s264_s20 }
  0x5d   : > { %396 = vmatpush3.bf16.msra.mxu0 %v395_v5  ;;  %v404_v14 = vpack.c.bf16 %v177_v13, %v176_v12  ;;  %v179_v16 = vld [vmem:[%s758_s16 + $0x48] sm:$0xff]  ;;  %v180_v18 = vld [vmem:[%s758_s16 + $0x50] sm:$0xff]  ;;  %v181_v19 = vld [vmem:[%s758_s16 + $0x58] sm:$0xff]  ;;  %s538_s25 = scalar_lea.vmem %s265_s20, 128  ;;  %p545_p12 = scmp.lt.s32.totalorder %s265_s20, %s265_s20 }
  0x5e   : > { %397 = vmatprep.subr.bf16.mxu0 %v612_v4  ;;  %v407_v17 = vpack.c.bf16 %v179_v16, %v178_v15  ;;  %v410_v20 = vpack.c.bf16 %v181_v19, %v180_v18  ;;  %v182_v21 = vld [vmem:[%s758_s16 + $0x60] sm:$0xff]  ;;  %v183_v22 = vld [vmem:[%s758_s16 + $0x68] sm:$0xff]  ;;  %v184_v24 = vld [vmem:[%s758_s16 + $0x70] sm:$0xff]  ;;  %p539_p4 = scmp.ne.s32.totalorder %s265_s20, %s538_s25  ;;  %p546_p5 = scmp.lt.s32.totalorder %s538_s25, %s538_s25 }
  0x5f   : > { %v413_v23 = vpack.c.bf16 %v183_v22, %v182_v21  ;;  %v185_v25 = vld [vmem:[%s758_s16 + $0x78] sm:$0xff]  ;;  %v169_v27 = vld [vmem:[#allocation7] sm:$0xff] }
  0x60   : > { %v416_v26 = vpack.c.bf16 %v185_v25, %v184_v24  ;;  %p540_p7 = pnand %p539_p4, %p439_p6  ;;  %p547_p10 = por %p546_p5, %p545_p12 }
  0x61   : > { %399 = vmatpush3.bf16.msra.mxu0 %v398_v8 }
  0x62   : > { %400 = vmatprep.subr.bf16.mxu0 %v612_v4  ;;  %p541_p11 = pneg %p540_p7 }
  0x64   : > { %p548_p0 = pnand %p547_p10, %p541_p11 }
  0x65   : > { %402 = vmatpush3.bf16.msra.mxu0 %v401_v11 }
  0x66   : > { %403 = vmatprep.subr.bf16.mxu0 %v612_v4 }
  0x69   : > { %405 = vmatpush3.bf16.msra.mxu0 %v404_v14 }
  0x6a   : > { %406 = vmatprep.subr.bf16.mxu0 %v612_v4 }
  0x6d   : > { %408 = vmatpush3.bf16.msra.mxu0 %v407_v17 }
  0x6e   : > { %409 = vmatprep.subr.bf16.mxu0 %v612_v4 }
  0x71   : > { %411 = vmatpush3.bf16.msra.mxu0 %v410_v20 }
  0x72   : > { %412 = vmatprep.subr.bf16.mxu0 %v612_v4 }
  0x75   : > { %414 = vmatpush3.bf16.msra.mxu0 %v413_v23 }
  0x76   : > { %415 = vmatprep.subr.bf16.mxu0 %v612_v4 }
  0x79   : > { %417 = vmatpush3.bf16.msra.mxu0 %v416_v26 }
  0x7c   : > { %392 = vmatmul.mubr.f32.vlgmr.msra.gmra.mrb[0].mxu0 %v169_v27 }
 0x14f   : > { %v252_v28 = vpop.f32.mrb[0].mxu0 }
 0x150   : > { %256 = vst [vmem:[#allocation7] sm:$0xff] %v252_v28  ;;  %v393_v29 = vpop.f32.mrb[1].mxu0 }
 0x151   : > { %551 = shalt.err (!%p548_p0)
}
 0x152   : > { %s552_s27 = scalar_lea.hbm %s820_s2, 128 }
 0x153   : > { %p553_p1 = scmp.ne.s32.totalorder %s820_s2, %s552_s27  ;;  %p558_p2 = scmp.lt.u32.totalorder %s552_s27, %s820_s2 }
 0x155   : > { %p554_p9 = pnand %p553_p1, %p439_p6 }
 0x157   : > { %p555_p13 = pneg %p554_p9 }
 0x159   : > { %p560_p3 = pnand %p558_p2, %p555_p13 }
 0x15b   : > { %563 = shalt.err (!%p560_p3)
}
 0x15c   : > { %425 = dma.vmem_to_hbm [thread:$0]  (%p439_p6), %s265_s20, 128, %s820_s2, [#allocation4]  }
 0x15d   : > { %589 = dma.done.wait (%p439_p6), [#allocation4], 128  }
 0x15e   : > { %591 = vsyncadd (%p439_p6), [#allocation4], 4294967168 }
 0x15f PF: > { %p14_p8 = scmp.ge.s32.totalorder %s653_s14, 7   ;;  %s836_s9 = smov %s598_s10 }
 0x160   : > { %s837_s10 = smov %s602_s11  ;;  %s838_s11 = smov %s663_s17 }
 0x161   : > { %s839_s12 = smov %s653_s14  ;;  %16 = sbr.rel (!%p14_p8) target bundleno = 5 (0x5), region = 74 }
 0x168   :  { %277 = vsyncpa [#allocation3], 1 }
 0x169   :  { %279 = vsyncpa [#allocation3 + $0x1], 1 }
 0x16a   :  { %280 = vsyncpa [#allocation6], 1 }
 0x16b   :  { %282 = vsyncpa [#allocation6 + $0x1], 1 }
 0x16c   :  { %283 = vsyncpa [#allocation4], 1 }
 0x16d   :  { %285 = vsyncpa [#allocation4 + $0x1], 1 }

</bundles_post_ra>
